<compile_context>
chip_gen: v7x
topology: tpu7x:2x2x1
jax: 0.10.0
libtpu: 0.0.40
codegen_flags: <defaults>
</compile_context>

<pallas_src>
import functools

import jax
import jax.numpy as jnp
from jax.experimental import pallas as pl
from jax.experimental.pallas import tpu as pltpu


def _rploss_kernel(dist_t_ref, labels_row_ref, labels_col_ref, feats_ref,
                   centers_ref, radius_ref, out_ref, *, temp, t_valid, tile_t):
    Kp1 = dist_t_ref.shape[0]

    logits = dist_t_ref[...].astype(jnp.float32) * (1.0 / temp)    # (K+1, TILE_T)
    labels_row = labels_row_ref[...]                               # (1, TILE_T) i32
    labels_col = labels_col_ref[...]                               # (TILE_T, 1) i32
    feats = feats_ref[...].astype(jnp.float32)                     # (TILE_T, D)
    centers = centers_ref[...].astype(jnp.float32)                 # (K+1, D)
    radius = radius_ref[0]                                         # scalar (SMEM)

    tile_start = pl.program_id(0) * tile_t

    # ---- cross entropy (lane-dense: classes on sublanes, proposals on lanes) ----
    class_ids = jax.lax.broadcasted_iota(jnp.int32, (Kp1, tile_t), 0)
    one_hot_t = (class_ids == labels_row).astype(jnp.float32)      # (K+1, TILE_T)
    m = jnp.max(logits, axis=0, keepdims=True)                     # (1, TILE_T)
    s = jnp.sum(jnp.exp(logits - m), axis=0, keepdims=True)
    lse = m + jnp.log(s)
    picked = jnp.sum(one_hot_t * logits, axis=0, keepdims=True)
    valid_row = (jax.lax.broadcasted_iota(jnp.int32, (1, tile_t), 1)
                 + tile_start) < t_valid
    ce_rows = jnp.where(valid_row, lse - picked, 0.0)              # (1, TILE_T)
    ce_partial = jnp.sum(ce_rows)

    # ---- reciprocal-point regularizer ----
    # center_batch[t] = centers[labels[t]]  (one-hot gather on the MXU)
    one_hot_g = (jax.lax.broadcasted_iota(jnp.int32, (tile_t, Kp1), 1)
                 == labels_col).astype(jnp.float32)                # (TILE_T, K+1)
    center_batch = jnp.dot(one_hot_g, centers,
                           preferred_element_type=jnp.float32)     # (TILE_T, D)
    diff = feats - center_batch
    dis = jnp.mean(diff * diff, axis=1, keepdims=True)             # (TILE_T, 1)
    r = dis - radius
    valid_col = (jax.lax.broadcasted_iota(jnp.int32, (tile_t, 1), 0)
                 + tile_start) < t_valid
    reg_rows = jnp.where(valid_col, r * r, 0.0)
    reg_partial = jnp.sum(reg_rows)

    # per-tile partials: row 0 = ce, row 1 = reg (broadcast across 128 lanes)
    row_sel = jax.lax.broadcasted_iota(jnp.int32, out_ref.shape, 1)
    out_ref[...] = jnp.where(row_sel == 0, ce_partial,
                             reg_partial).astype(jnp.float32)


def rploss_pallas(dist, targets, feats, centers, radius, *,
                  temp=1.0, weight_pl=0.1, size_average=False, reduction=False,
                  tile_t=1024):
    """RPLoss forward (gcpl=False path)."""
    # TODO(synk): gcpl=True branch of RPLoss is not implemented (default cfg is gcpl=False).
    T, Kp1 = dist.shape
    D = feats.shape[1]

    # Lane-aligned tile over proposals (multiple of 128), shrunk for small T.
    tile_t = max(128, (min(int(tile_t), 4096) // 128) * 128)
    t_pad_min = pl.cdiv(T, 128) * 128
    tile_t = min(tile_t, t_pad_min)
    num_tiles = pl.cdiv(T, tile_t)
    t_pad = num_tiles * tile_t
    pad = t_pad - T

    labels = targets.reshape(-1).astype(jnp.int32)
    labels_p = jnp.pad(labels, (0, pad))
    dist_t = jnp.pad(dist, ((0, pad), (0, 0))).T          # (K+1, T_pad) lane-dense
    labels_row = labels_p.reshape(1, t_pad)
    labels_col = labels_p.reshape(t_pad, 1)
    feats_p = jnp.pad(feats, ((0, pad), (0, 0)))          # (T_pad, D)
    radius_s = jnp.reshape(radius, (-1,))[:1].astype(jnp.float32)  # (1,) -> SMEM

    kernel = functools.partial(_rploss_kernel, temp=float(temp),
                               t_valid=T, tile_t=tile_t)

    itemsize = 4
    tile_bytes = itemsize * (tile_t * (D + Kp1 + 2) + Kp1 * D) + 2 * 128 * 4
    vmem_limit = int(min(max(4 * tile_bytes + (2 << 20), 8 << 20), 64 << 20))

    cost = pl.CostEstimate(
        flops=int(2 * T * Kp1 * D + 8 * T * D + 12 * T * Kp1),
        transcendentals=int(T * (Kp1 + 1)),
        bytes_accessed=int(4 * (T * (D + Kp1 + 2) + Kp1 * D)
                           + num_tiles * 2 * 128 * 4),
    )

    partials = pl.pallas_call(
        kernel,
        out_shape=jax.ShapeDtypeStruct((num_tiles, 2, 128), jnp.float32),
        grid=(num_tiles,),
        in_specs=[
            pl.BlockSpec((Kp1, tile_t), lambda i: (0, i)),   # dist^T
            pl.BlockSpec((1, tile_t), lambda i: (0, i)),     # labels (row)
            pl.BlockSpec((tile_t, 1), lambda i: (i, 0)),     # labels (col)
            pl.BlockSpec((tile_t, D), lambda i: (i, 0)),     # feats
            pl.BlockSpec((Kp1, D), lambda i: (0, 0)),        # centers (resident)
            pl.BlockSpec(memory_space=pltpu.MemorySpace.SMEM),  # radius scalar
        ],
        out_specs=pl.BlockSpec((1, 2, 128), lambda i: (i, 0, 0)),
        compiler_params=pltpu.CompilerParams(
            dimension_semantics=("parallel",),
            vmem_limit_bytes=vmem_limit),
        cost_estimate=cost,
    )(dist_t, labels_row, labels_col, feats_p, centers, radius_s)

    ce_sum = jnp.sum(partials[:, 0, 0])
    reg_sum = jnp.sum(partials[:, 1, 0])
    if bool(size_average) or bool(reduction):
        ce_sum = ce_sum / T
        reg_sum = reg_sum / T
    return ce_sum + float(weight_pl) * reg_sum


def rploss_ref(dist, targets, feats, centers, radius, *,
               temp=1.0, weight_pl=0.1, size_average=False, reduction=False):
    """Pure-JAX reference matching the PyTorch forward (gcpl=False)."""
    labels = targets.reshape(-1)
    logits = dist.astype(jnp.float32) / temp
    lse = jax.scipy.special.logsumexp(logits, axis=1)
    picked = jnp.take_along_axis(logits, labels[:, None], axis=1)[:, 0]
    center_batch = centers[labels, :].astype(jnp.float32)
    dis = jnp.mean((feats.astype(jnp.float32) - center_batch) ** 2, axis=1)
    r0 = jnp.reshape(radius, (-1,))[0]
    ce_terms = lse - picked
    reg_terms = (dis - r0) ** 2
    if size_average or reduction:
        return jnp.mean(ce_terms) + weight_pl * jnp.mean(reg_terms)
    return jnp.sum(ce_terms) + weight_pl * jnp.sum(reg_terms)


if __name__ == "__main__":
    key = jax.random.PRNGKey(0)
    k1, k2, k3, k4, k5, k6, k7, k8 = jax.random.split(key, 8)

    # Small shapes consistent with the module: T proposals, K+1 classes, D features.
    num_classes = 4
    T, Kp1, D = 8, num_classes + 1, 32
    dist = jax.random.normal(k1, (T, Kp1), dtype=jnp.float32)
    targets = jax.random.randint(k2, (T, 1), 0, Kp1, dtype=jnp.int32)
    feats = jax.random.normal(k3, (T, D), dtype=jnp.float32)
    centers = jax.random.normal(k4, (Kp1, D), dtype=jnp.float32)
    radius = jnp.zeros((1,), dtype=jnp.float32)   # nn.Parameter(1), init 0

    loss = rploss_pallas(dist, targets, feats, centers, radius)
    jax.block_until_ready(loss)
    ref = rploss_ref(dist, targets, feats, centers, radius)
    assert jnp.allclose(loss, ref, rtol=1e-5, atol=1e-5), (loss, ref)

    # Multi-tile path with tail masking (T not a multiple of the tile size).
    T2, D2 = 300, 64
    dist2 = jax.random.normal(k5, (T2, Kp1), dtype=jnp.float32)
    targets2 = jax.random.randint(k6, (T2, 1), 0, Kp1, dtype=jnp.int32)
    feats2 = jax.random.normal(k7, (T2, D2), dtype=jnp.float32)
    centers2 = jax.random.normal(k8, (Kp1, D2), dtype=jnp.float32)
    loss2 = rploss_pallas(dist2, targets2, feats2, centers2, radius, tile_t=128)
    jax.block_until_ready(loss2)
    ref2 = rploss_ref(dist2, targets2, feats2, centers2, radius)
    assert jnp.allclose(loss2, ref2, rtol=1e-4, atol=1e-4), (loss2, ref2)

    print("KERNEL_OK")
</pallas_src>

<mosaic_0001>
module attributes {stable_mosaic.version = 11 : i64} {
  func.func @_rploss_kernel(%arg0: i32, %arg1: memref<5x128xf32, #tpu.memory_space<vmem>>, %arg2: memref<1x128xi32, #tpu.memory_space<vmem>>, %arg3: memref<128x1xi32, #tpu.memory_space<vmem>>, %arg4: memref<128x32xf32, #tpu.memory_space<vmem>>, %arg5: memref<5x32xf32, #tpu.memory_space<vmem>>, %arg6: memref<1xf32, #tpu.memory_space<smem>>, %arg7: memref<1x2x128xf32, #tpu.memory_space<vmem>>) attributes {dimension_semantics = [#tpu.dimension_semantics<parallel>], iteration_bounds = array<i64: 1>, scalar_prefetch = 0 : i64, scratch_operands = 0 : i64, tpu.core_type = #tpu.core_type<tc>, window_params = [{transform_indices = @transform_0, window_bounds = array<i64: 5, 128>}, {transform_indices = @transform_1, window_bounds = array<i64: 1, 128>}, {transform_indices = @transform_2, window_bounds = array<i64: 128, 1>}, {transform_indices = @transform_3, window_bounds = array<i64: 128, 32>}, {pipeline_mode = #tpu.pipeline_mode<synchronous>, transform_indices = @transform_4, window_bounds = array<i64: 5, 32>}, {transform_indices = @transform_5, window_bounds = array<i64: 1>}, {transform_indices = @transform_6, window_bounds = array<i64: 1, 2, 128>}]} {
    %c0 = arith.constant 0 : index
    %c0_0 = arith.constant 0 : index
    %0 = vector.load %arg1[%c0, %c0_0] : memref<5x128xf32, #tpu.memory_space<vmem>>, vector<5x128xf32>
    %cst = arith.constant 1.000000e+00 : f32
    %1 = vector.broadcast %cst : f32 to vector<5x128xf32>
    %2 = arith.mulf %0, %1 : vector<5x128xf32>
    %c0_1 = arith.constant 0 : index
    %c0_2 = arith.constant 0 : index
    %3 = vector.load %arg2[%c0_1, %c0_2] : memref<1x128xi32, #tpu.memory_space<vmem>>, vector<1x128xi32>
    %c0_3 = arith.constant 0 : index
    %c0_4 = arith.constant 0 : index
    %4 = vector.load %arg3[%c0_3, %c0_4] : memref<128x1xi32, #tpu.memory_space<vmem>>, vector<128x1xi32>
    %c0_5 = arith.constant 0 : index
    %c0_6 = arith.constant 0 : index
    %5 = vector.load %arg4[%c0_5, %c0_6] : memref<128x32xf32, #tpu.memory_space<vmem>>, vector<128x32xf32>
    %c0_7 = arith.constant 0 : index
    %c0_8 = arith.constant 0 : index
    %6 = vector.load %arg5[%c0_7, %c0_8] : memref<5x32xf32, #tpu.memory_space<vmem>>, vector<5x32xf32>
    %c0_9 = arith.constant 0 : index
    %7 = memref.load %arg6[%c0_9] : memref<1xf32, #tpu.memory_space<smem>>
    %c128_i32 = arith.constant 128 : i32
    %8 = arith.muli %arg0, %c128_i32 : i32
    %9 = tpu.iota {dimensions = array<i32: 0>} : vector<5x128xi32>
    %10 = vector.broadcast %3 : vector<1x128xi32> to vector<5x128xi32>
    %11 = arith.cmpi eq, %9, %10 : vector<5x128xi32>
    %12 = arith.extui %11 : vector<5x128xi1> to vector<5x128xi32>
    %13 = arith.sitofp %12 : vector<5x128xi32> to vector<5x128xf32>
    %cst_10 = arith.constant dense<0xFF800000> : vector<128xf32>
    %14 = vector.multi_reduction <maximumf>, %2, %cst_10 [0] : vector<5x128xf32> to vector<128xf32>
    %15 = vector.shape_cast %14 : vector<128xf32> to vector<1x128xf32>
    %16 = vector.broadcast %15 : vector<1x128xf32> to vector<5x128xf32>
    %17 = arith.subf %2, %16 : vector<5x128xf32>
    %18 = math.exp %17 : vector<5x128xf32>
    %cst_11 = arith.constant dense<0.000000e+00> : vector<128xf32>
    %19 = vector.multi_reduction <add>, %18, %cst_11 [0] : vector<5x128xf32> to vector<128xf32>
    %20 = vector.shape_cast %19 : vector<128xf32> to vector<1x128xf32>
    %21 = math.log %20 : vector<1x128xf32>
    %22 = arith.addf %15, %21 : vector<1x128xf32>
    %23 = arith.mulf %13, %2 : vector<5x128xf32>
    %cst_12 = arith.constant dense<0.000000e+00> : vector<128xf32>
    %24 = vector.multi_reduction <add>, %23, %cst_12 [0] : vector<5x128xf32> to vector<128xf32>
    %25 = vector.shape_cast %24 : vector<128xf32> to vector<1x128xf32>
    %26 = tpu.iota {dimensions = array<i32: 1>} : vector<1x128xi32>
    %27 = vector.broadcast %8 : i32 to vector<1x128xi32>
    %28 = arith.addi %26, %27 : vector<1x128xi32>
    %c8_i32 = arith.constant 8 : i32
    %29 = vector.broadcast %c8_i32 : i32 to vector<1x128xi32>
    %30 = arith.cmpi slt, %28, %29 : vector<1x128xi32>
    %31 = arith.subf %22, %25 : vector<1x128xf32>
    %cst_13 = arith.constant 0.000000e+00 : f32
    %32 = vector.broadcast %cst_13 : f32 to vector<1x128xf32>
    %33 = arith.select %30, %31, %32 : vector<1x128xi1>, vector<1x128xf32>
    %34 = vector.shape_cast %33 : vector<1x128xf32> to vector<1x1x128xf32>
    %cst_14 = arith.constant dense<0.000000e+00> : vector<1xf32>
    %35 = vector.multi_reduction <add>, %34, %cst_14 [1, 2] : vector<1x1x128xf32> to vector<1xf32>
    %36 = vector.shape_cast %35 : vector<1xf32> to vector<1x1x1xf32>
    %37 = vector.extract %36[0, 0, 0] : f32 from vector<1x1x1xf32>
    %38 = tpu.iota {dimensions = array<i32: 1>} : vector<128x5xi32>
    %39 = vector.broadcast %4 : vector<128x1xi32> to vector<128x5xi32>
    %40 = arith.cmpi eq, %38, %39 : vector<128x5xi32>
    %41 = arith.extui %40 : vector<128x5xi1> to vector<128x5xi32>
    %42 = arith.sitofp %41 : vector<128x5xi32> to vector<128x5xf32>
    %cst_15 = arith.constant dense<0.000000e+00> : vector<128x32xf32>
    %43 = tpu.matmul %42, %6, %cst_15 {dimension_numbers = #tpu.dot_dimension_numbers<[1], [0], [0], [1], [0, 0, 1, 1], [], []>} : vector<128x5xf32>, vector<5x32xf32>, vector<128x32xf32> -> vector<128x32xf32>
    %44 = arith.subf %5, %43 : vector<128x32xf32>
    %45 = arith.mulf %44, %44 : vector<128x32xf32>
    %cst_16 = arith.constant dense<0.000000e+00> : vector<128xf32>
    %46 = vector.multi_reduction <add>, %45, %cst_16 [1] : vector<128x32xf32> to vector<128xf32>
    %47 = vector.shape_cast %46 : vector<128xf32> to vector<128x1xf32>
    %cst_17 = arith.constant 3.200000e+01 : f32
    %48 = vector.broadcast %cst_17 : f32 to vector<128x1xf32>
    %49 = arith.divf %47, %48 : vector<128x1xf32>
    %50 = vector.broadcast %7 : f32 to vector<128x1xf32>
    %51 = arith.subf %49, %50 : vector<128x1xf32>
    %52 = tpu.iota {dimensions = array<i32: 0>} : vector<128x1xi32>
    %53 = vector.broadcast %8 : i32 to vector<128x1xi32>
    %54 = arith.addi %52, %53 : vector<128x1xi32>
    %c8_i32_18 = arith.constant 8 : i32
    %55 = vector.broadcast %c8_i32_18 : i32 to vector<128x1xi32>
    %56 = arith.cmpi slt, %54, %55 : vector<128x1xi32>
    %57 = arith.mulf %51, %51 : vector<128x1xf32>
    %cst_19 = arith.constant 0.000000e+00 : f32
    %58 = vector.broadcast %cst_19 : f32 to vector<128x1xf32>
    %59 = arith.select %56, %57, %58 : vector<128x1xi1>, vector<128x1xf32>
    %60 = vector.shape_cast %59 : vector<128x1xf32> to vector<1x128x1xf32>
    %cst_20 = arith.constant dense<0.000000e+00> : vector<1xf32>
    %61 = vector.multi_reduction <add>, %60, %cst_20 [1, 2] : vector<1x128x1xf32> to vector<1xf32>
    %62 = vector.shape_cast %61 : vector<1xf32> to vector<1x1x1xf32>
    %63 = vector.extract %62[0, 0, 0] : f32 from vector<1x1x1xf32>
    %64 = tpu.iota {dimensions = array<i32: 1>} : vector<1x2x128xi32>
    %c0_i32 = arith.constant 0 : i32
    %65 = vector.broadcast %c0_i32 : i32 to vector<1x2x128xi32>
    %66 = arith.cmpi eq, %64, %65 : vector<1x2x128xi32>
    %67 = vector.broadcast %37 : f32 to vector<1x2x128xf32>
    %68 = vector.broadcast %63 : f32 to vector<1x2x128xf32>
    %69 = arith.select %66, %67, %68 : vector<1x2x128xi1>, vector<1x2x128xf32>
    %c0_21 = arith.constant 0 : index
    %c0_22 = arith.constant 0 : index
    %c0_23 = arith.constant 0 : index
    %70 = vector.load %arg7[%c0_21, %c0_22, %c0_23] : memref<1x2x128xf32, #tpu.memory_space<vmem>>, vector<1x2x128xf32>
    tpu.vector_store %arg7[%c0_21, %c0_22, %c0_23], %69 {strides = array<i32>} : memref<1x2x128xf32, #tpu.memory_space<vmem>>, vector<1x2x128xf32>,
    return
  }
  func.func @transform_0(%arg0: i32) -> (i32, i32) {
    %c0_i32 = arith.constant 0 : i32
    %c0_i32_0 = arith.constant 0 : i32
    return %c0_i32, %arg0 : i32, i32
  }
  func.func @transform_1(%arg0: i32) -> (i32, i32) {
    %c0_i32 = arith.constant 0 : i32
    %c0_i32_0 = arith.constant 0 : i32
    return %c0_i32, %arg0 : i32, i32
  }
  func.func @transform_2(%arg0: i32) -> (i32, i32) {
    %c0_i32 = arith.constant 0 : i32
    %c0_i32_0 = arith.constant 0 : i32
    return %arg0, %c0_i32 : i32, i32
  }
  func.func @transform_3(%arg0: i32) -> (i32, i32) {
    %c0_i32 = arith.constant 0 : i32
    %c0_i32_0 = arith.constant 0 : i32
    return %arg0, %c0_i32 : i32, i32
  }
  func.func @transform_4(%arg0: i32) -> (i32, i32) {
    %c0_i32 = arith.constant 0 : i32
    %c0_i32_0 = arith.constant 0 : i32
    %c0_i32_1 = arith.constant 0 : i32
    return %c0_i32, %c0_i32_0 : i32, i32
  }
  func.func @transform_5(%arg0: i32) -> i32 {
    %c0_i32 = arith.constant 0 : i32
    %c0_i32_0 = arith.constant 0 : i32
    return %c0_i32 : i32
  }
  func.func @transform_6(%arg0: i32) -> (i32, i32, i32) {
    %c0_i32 = arith.constant 0 : i32
    %c0_i32_0 = arith.constant 0 : i32
    %c0_i32_1 = arith.constant 0 : i32
    return %arg0, %c0_i32, %c0_i32_0 : i32, i32, i32
  }
}

</mosaic_0001>

<bundles_post_ra>
// kernel: tpu_custom_call.1
= control target key start
LH: loop header
LB: loop body
LE: loop exit
PB: predicated region body
PF: predicated region fallthrough
CT: control target
= control target key end

     0   :  { %v782_v1 = vmov 0   ;;  %s960_s0 = inlined_call_operand.vmem [shape: f32[5,128], index: 0, kind: input, shape index: {}]   ;;  %s961_s1 = inlined_call_operand.vmem [shape: s32[1,128], index: 1, kind: input, shape index: {}]   ;;  %s962_s2 = inlined_call_operand.vmem [shape: s32[128,1], index: 2, kind: input, shape index: {}]   ;;  %s963_s3 = inlined_call_operand.vmem [shape: f32[128,32], index: 3, kind: input, shape index: {}]   ;;  %s964_s4 = inlined_call_operand.vmem [shape: f32[5,32], index: 4, kind: input, shape index: {}]   ;;  %s965_s5 = inlined_call_operand.<no memory space> [shape: f32[1], index: 5, kind: input, shape index: {}]   ;;  %s966_s6 = inlined_call_operand.hbm [shape: f32[1,2,128], index: 6, kind: output, shape index: {}]  }
   0x1   :  { %v27_v0 = vld [vmem:[%s962_s2] sm:$0xff]  ;;  %752 = vset.pattern.permute.xlu0 %v782_v1  ;;  %753 = vset.pattern.permute.xlu1 %v782_v1 }
   0x2   :  { %119 = vperm.xlu0 %752, %v27_v0  }
   0x3   :  { %12 = vsyncpa [#allocation4], 0  ;;  %v28_v2 = vld [vmem:[%s962_s2 + $0x8] sm:$0xff]  ;;  %v59_v3 = vld [vmem:[%s964_s4] sm:$0x1f]  ;;  %vm71_vm0 = vcmask 1044480   ;;  %v62_v18 = vlaneseq }
   0x4   :  { %717 = vmatprep.subr.msk.mxu0 %vm71_vm0, %v59_v3  ;;  %v29_v4 = vld [vmem:[%s962_s2 + $0x10] sm:$0xff]  ;;  %743 = vmatprep.subr.msk.mxu1 %vm71_vm0, %v59_v3  ;;  %v30_v5 = vld [vmem:[%s962_s2 + $0x18] sm:$0xff]  ;;  %v31_v6 = vld [vmem:[%s962_s2 + $0x20] sm:$0xff]  ;;  %vm214_vm1 = vcmask 39936   ;;  %v783_v21 = vmov 0.0   ;;  %s784_s9 = smov [#allocation3]  }
   0x5   :  { %718 = vmatpush3.msk.msra.mxu0 %vm71_vm0, %v59_v3  ;;  %744 = vmatpush3.msk.msra.mxu1 %vm71_vm0, %v59_v3  ;;  %v32_v7 = vld [vmem:[%s962_s2 + $0x28] sm:$0xff]  ;;  %v33_v8 = vld [vmem:[%s962_s2 + $0x30] sm:$0xff]  ;;  %v34_v9 = vld [vmem:[%s962_s2 + $0x38] sm:$0xff]  ;;  %v876_v19 = vand.u32 127, %v62_v18  ;;  %s657_s10 = sshll.u32 %s784_s9, 4  ;;  %s658_s10 = int_to_ptr.vmem [resolvable:$true] %s657_s10 }
   0x6   :  { %122 = vperm.xlu0 %752, %v28_v2   ;;  %v35_v10 = vld [vmem:[%s962_s2 + $0x40] sm:$0xff]  ;;  %v36_v11 = vld [vmem:[%s962_s2 + $0x48] sm:$0xff]  ;;  %v37_v12 = vld [vmem:[%s962_s2 + $0x50] sm:$0xff]  ;;  %s758_s12 = scalar_lea.vmem %s658_s10, 32  ;;  %p763_p1 = scmp.lt.s32.totalorder %s658_s10, %s658_s10 }
   0x7   :  { %143 = vperm.xlu1 %753, %v35_v10   ;;  %v38_v13 = vld [vmem:[%s962_s2 + $0x58] sm:$0xff]  ;;  %v39_v14 = vld [vmem:[%s962_s2 + $0x60] sm:$0xff]  ;;  %v40_v15 = vld [vmem:[%s962_s2 + $0x68] sm:$0xff]  ;;  %p759_p0 = scmp.ne.s32.totalorder %s658_s10, %s758_s12  ;;  %p764_p2 = scmp.lt.s32.totalorder %s758_s12, %s758_s12 }
   0x8   :  { %v41_v16 = vld [vmem:[%s962_s2 + $0x70] sm:$0xff]  ;;  %v42_v17 = vld [vmem:[%s962_s2 + $0x78] sm:$0xff]  ;;  %v25_v53 = vld [vmem:[%s960_s0] sm:$0x1f] }
   0x9   :  { %v72_v54 = vsel %vm71_vm0, %v25_v53, -inf  ;;  %p765_p3 = por %p764_p2, %p763_p1 }
   0xa   :  { %125 = vperm.xlu0 %752, %v29_v4   ;;  %v73_v55 = vrot.slane %v72_v54, 4 }
   0xb   :  { %146 = vperm.xlu1 %753, %v36_v11   ;;  %p766_p4 = pnand %p765_p3, %p759_p0 }
   0xc   :  { %v74_v56 = vmax.f32 %v72_v54, %v73_v55 }
   0xe   :  { %128 = vperm.xlu0 %752, %v30_v5   ;;  %v75_v57 = vrot.slane %v74_v56, 2  ;;  %v43_v5 = vld [vmem:[%s963_s3] sm:$0xff] }
   0xf   :  { %149 = vperm.xlu1 %753, %v37_v12  }
  0x10   :  { %v76_v58 = vmax.f32 %v74_v56, %v75_v57 }
  0x12   :  { %131 = vperm.xlu0 %752, %v31_v6   ;;  %v77_v59 = vrot.slane %v76_v58, 1  ;;  %v935_v6 = vshrl.u32 %v62_v18, 7 }
  0x13   :  { %152 = vperm.xlu1 %753, %v38_v13  }
  0x14   :  { %v78_v60 = vmax.f32 %v76_v58, %v77_v59 }
  0x16   :  { %134 = vperm.xlu0 %752, %v32_v7   ;;  %v79_v61 = vsub.f32 %v25_v53, %v78_v60 }
  0x17   :  { %155 = vperm.xlu1 %753, %v39_v14  }
  0x18   :  { %v80_v62 = vmul.f32 1.442695, %v79_v61 }
  0x1a   :  { %137 = vperm.xlu0 %752, %v33_v8   ;;  %754 = vpow2.f32 %v80_v62 }
  0x1b   :  { %158 = vperm.xlu1 %753, %v40_v15  }
  0x1e   :  { %140 = vperm.xlu0 %752, %v34_v9   ;;  %v665_v9 = vld [vmem:[%s961_s1] ss:$0 sm:$0xff] }
  0x1f   :  { %161 = vperm.xlu1 %753, %v41_v16  }
  0x23   :  { %164 = vperm.xlu1 %753, %v42_v17  }
  0x24   :  { %v755_v63 = vpop.eup %754 }
  0x25   :  { %v82_v0 = vsel %vm71_vm0, %v755_v63, 0.0 }
  0x26   :  { %v83_v1 = vrot.slane %v82_v0, 4 }
  0x28   :  { %v84_v2 = vadd.f32 %v83_v1, %v82_v0 }
  0x2a   :  { %v85_v3 = vrot.slane %v84_v2, 2 }
  0x2c   :  { %v86_v4 = vadd.f32 %v85_v3, %v84_v2 }
  0x2e   :  { %v87_v7 = vrot.slane %v86_v4, 1 }
  0x30   :  { %v88_v11 = vadd.f32 %v87_v7, %v86_v4 }
  0x32   :  { %756 = vlog2.f32 %v88_v11 }
  0x81   :  { %v120_v20 = vpop.permute.xlu0 %119 }
  0x82   :  { %vm166_vm2 = vcmp.eq.s32.totalorder %v876_v19, %v120_v20 }
  0x83   :  { %v667_v22 = vsel %vm166_vm2, 1.0, %v783_v21 }
  0x84   :  { %719 = vmatprep.mubr.msk.f32.mxu0 %vm214_vm1, %v667_v22 }
  0x85   :  { %v123_v23 = vpop.permute.xlu0 %122 }
  0x86   :  { %vm167_vm3 = vcmp.eq.s32.totalorder %v876_v19, %v123_v23  ;;  %v144_v37 = vpop.permute.xlu1 %143 }
  0x87   :  { %v668_v24 = vsel %vm167_vm3, 1.0, %v783_v21  ;;  %vm174_vm10 = vcmp.eq.s32.totalorder %v876_v19, %v144_v37 }
  0x88   :  { %720 = vmatmul.mubr.msk.f32.vlgmr.msra.gmra.mrb[0].mxu0 %vm214_vm1, %v668_v24  ;;  %v675_v38 = vsel %vm174_vm10, 1.0, %v783_v21 }
  0x89   :  { %v126_v25 = vpop.permute.xlu0 %125  ;;  %731 = vmatprep.mubr.msk.f32.mxu1 %vm214_vm1, %v675_v38 }
  0x8a   :  { %vm168_vm4 = vcmp.eq.s32.totalorder %v876_v19, %v126_v25  ;;  %v147_v39 = vpop.permute.xlu1 %146 }
  0x8b   :  { %v669_v26 = vsel %vm168_vm4, 1.0, %v783_v21  ;;  %vm175_vm11 = vcmp.eq.s32.totalorder %v876_v19, %v147_v39  ;;  %vm443_vm4 = vcmask 261120  }
  0x8c   :  { %722 = vmatprep.mubr.msk.f32.mxu0 %vm214_vm1, %v669_v26  ;;  %v676_v40 = vsel %vm175_vm11, 1.0, %v783_v21  ;;  %v757_v26 = vpop.eup %756 }
  0x8d   :  { %v129_v27 = vpop.permute.xlu0 %128  ;;  %732 = vmatmul.mubr.msk.f32.vlgmr.msra.gmra.mrb[0].mxu1 %vm214_vm1, %v676_v40 }
  0x8e   :  { %vm169_vm5 = vcmp.eq.s32.totalorder %v876_v19, %v129_v27  ;;  %v150_v41 = vpop.permute.xlu1 %149  ;;  %v90_v27 = vmul.f32 0.6931472, %v757_v26 }
  0x8f   :  { %v670_v28 = vsel %vm169_vm5, 1.0, %v783_v21  ;;  %vm176_vm12 = vcmp.eq.s32.totalorder %v876_v19, %v150_v41  ;;  %vm104_vm5 = vcmp.lt.s32.totalorder %v876_v19, 8 }
  0x90   :  { %723 = vmatmul.mubr.msk.f32.gmra.mrb[2].mxu0 %vm214_vm1, %v670_v28  ;;  %v677_v42 = vsel %vm176_vm12, 1.0, %v783_v21 }
  0x91   :  { %v132_v29 = vpop.permute.xlu0 %131  ;;  %734 = vmatprep.mubr.msk.f32.mxu1 %vm214_vm1, %v677_v42 }
  0x92   :  { %vm170_vm6 = vcmp.eq.s32.totalorder %v876_v19, %v132_v29  ;;  %v153_v43 = vpop.permute.xlu1 %152 }
  0x93   :  { %v671_v30 = vsel %vm170_vm6, 1.0, %v783_v21  ;;  %vm177_vm13 = vcmp.eq.s32.totalorder %v876_v19, %v153_v43  ;;  %vm605_vm6 = vcmask 7168  }
  0x94   :  { %725 = vmatprep.mubr.msk.f32.mxu0 %vm214_vm1, %v671_v30  ;;  %v678_v44 = vsel %vm177_vm13, 1.0, %v783_v21  ;;  %v91_v30 = vadd.f32 %v90_v27, %v78_v60 }
  0x95   :  { %v135_v31 = vpop.permute.xlu0 %134  ;;  %735 = vmatmul.mubr.msk.f32.gmra.mrb[2].mxu1 %vm214_vm1, %v678_v44 }
  0x96   :  { %vm171_vm7 = vcmp.eq.s32.totalorder %v876_v19, %v135_v31  ;;  %v156_v45 = vpop.permute.xlu1 %155 }
  0x97   :  { %v672_v32 = vsel %vm171_vm7, 1.0, %v783_v21  ;;  %vm178_vm14 = vcmp.eq.s32.totalorder %v876_v19, %v156_v45  ;;  %v509_v45 = vstv %s965_s5  ;;  %vm646_vm7 = vcmp.eq.s32.totalorder %v935_v6, 0 }
  0x98   :  { %726 = vmatmul.mubr.msk.f32.gmra.mrb[4].mxu0 %vm214_vm1, %v672_v32  ;;  %v679_v46 = vsel %vm178_vm14, 1.0, %v783_v21 }
  0x99   :  { %v138_v33 = vpop.permute.xlu0 %137  ;;  %737 = vmatprep.mubr.msk.f32.mxu1 %vm214_vm1, %v679_v46 }
  0x9a   :  { %vm172_vm8 = vcmp.eq.s32.totalorder %v876_v19, %v138_v33  ;;  %v159_v47 = vpop.permute.xlu1 %158 }
  0x9b   :  { %v673_v34 = vsel %vm172_vm8, 1.0, %v783_v21  ;;  %vm179_vm15 = vcmp.eq.s32.totalorder %v876_v19, %v159_v47 }
  0x9c   :  { %728 = vmatprep.mubr.msk.f32.mxu0 %vm214_vm1, %v673_v34  ;;  %v680_v48 = vsel %vm179_vm15, 1.0, %v783_v21 }
  0x9d   :  { %v141_v35 = vpop.permute.xlu0 %140  ;;  %738 = vmatmul.mubr.msk.f32.gmra.mrb[4].mxu1 %vm214_vm1, %v680_v48 }
  0x9e   :  { %vm173_vm9 = vcmp.eq.s32.totalorder %v876_v19, %v141_v35  ;;  %v162_v49 = vpop.permute.xlu1 %161 }
  0x9f   :  { %v674_v36 = vsel %vm173_vm9, 1.0, %v783_v21  ;;  %vm180_vm2 = vcmp.eq.s32.totalorder %v876_v19, %v162_v49 }
  0xa0   :  { %729 = vmatmul.mubr.msk.f32.gmra.mrb[6].mxu0 %vm214_vm1, %v674_v36  ;;  %v681_v50 = vsel %vm180_vm2, 1.0, %v783_v21 }
  0xa1   :  { %740 = vmatprep.mubr.msk.f32.mxu1 %vm214_vm1, %v681_v50 }
  0xa2   :  { %v165_v51 = vpop.permute.xlu1 %164 }
  0xa3   :  { %vm181_vm3 = vcmp.eq.s32.totalorder %v876_v19, %v165_v51 }
  0xa4   :  { %v682_v52 = vsel %vm181_vm3, 1.0, %v783_v21 }
  0xa5   :  { %741 = vmatmul.mubr.msk.f32.gmra.mrb[6].mxu1 %vm214_vm1, %v682_v52  ;;  %vm68_vm1 = vcmp.eq.s32.totalorder %v935_v6, %v665_v9 }
  0xa6   :  { %v666_v13 = vsel %vm68_vm1, 1.0, %v783_v21 }
  0xa7   :  { %v92_v14 = vmul.f32 %v666_v13, %v25_v53 }
  0xa9   :  { %v93_v16 = vsel %vm71_vm0, %v92_v14, 0.0  ;;  %vm107_vm0 = vcmask 1040384  }
  0xaa   :  { %v94_v18 = vrot.slane %v93_v16, 4 }
  0xac   :  { %v95_v22 = vadd.f32 %v94_v18, %v93_v16 }
  0xae   :  { %v96_v24 = vrot.slane %v95_v22, 2 }
  0xb0   :  { %v97_v25 = vadd.f32 %v96_v24, %v95_v22 }
  0xb2   :  { %v98_v28 = vrot.slane %v97_v25, 1 }
  0xb4   :  { %v99_v21 = vadd.f32 %v98_v28, %v97_v25 }
  0xb6   :  { %v105_v32 = vsub.f32 %v91_v30, %v99_v21 }
  0xb8   :  { %v106_v33 = vsel %vm104_vm5, %v105_v32, 0.0 }
  0xb9   :  { %v108_v34 = vsel %vm107_vm0, %v106_v33, 0.0 }
  0xba   :  { %109 = vadd.xlane.f32.xlu1 %v108_v34 }
 0x147   :  { %v110_v50 = vpop.xlane.xlu1 %109 }
 0x148   :  { %v111_v51 = vrot.slane %v110_v50, 4 }
 0x14a   :  { %v112_v52 = vadd.f32 %v111_v51, %v110_v50 }
 0x14c   :  { %v113_v53 = vrot.slane %v112_v52, 2 }
 0x14e   :  { %v114_v54 = vadd.f32 %v113_v53, %v112_v52 }
 0x150   :  { %v115_v55 = vrot.slane %v114_v54, 1 }
 0x152   :  { %v116_v56 = vadd.f32 %v115_v55, %v114_v54 }
 0x154   :  { %745 = vpush %v116_v56 }
 0x15b   :  { %v721_v8 = vpop.f32.mrb[0].mxu0 }
 0x15c   :  { %v332_v10 = vpop.f32.mrb[1].mxu0 }
 0x15d   :  { %v411_v12 = vsub.f32 %v43_v5, %v332_v10 }
 0x15f   :  { %v427_v15 = vmul.f32 %v411_v12, %v411_v12 }
 0x160   :  { %v733_v37 = vpop.f32.mrb[0].mxu1 }
 0x161   :  { %v444_v17 = vsel %vm443_vm4, %v427_v15, 0.0  ;;  %v372_v38 = vpop.f32.mrb[1].mxu1 }
 0x162   :  { %445 = vadd.xlane.f32.xlu0 %v444_v17 }
 0x163   :  { %v724_v20 = vpop.f32.mrb[2].mxu0 }
 0x164   :  { %v342_v23 = vpop.f32.mrb[3].mxu0 }
 0x168   :  { %v736_v39 = vpop.f32.mrb[2].mxu1 }
 0x169   :  { %v382_v40 = vpop.f32.mrb[3].mxu1 }
 0x16b   :  { %v727_v29 = vpop.f32.mrb[4].mxu0 }
 0x16c   :  { %v352_v31 = vpop.f32.mrb[5].mxu0 }
 0x170   :  { %v739_v41 = vpop.f32.mrb[4].mxu1 }
 0x171   :  { %v392_v42 = vpop.f32.mrb[5].mxu1 }
 0x173   :  { %v730_v35 = vpop.f32.mrb[6].mxu0 }
 0x174   :  { %v362_v36 = vpop.f32.mrb[7].mxu0 }
 0x178   :  { %v742_v43 = vpop.f32.mrb[6].mxu1 }
 0x179   :  { %v402_v44 = vpop.f32.mrb[7].mxu1 }
 0x185   :  { %s746_s5 = spop %745 }
 0x186   :  { %v647_v0 = vstv %s746_s5 }
 0x1ef   :  { %v446_v46 = vpop.xlane.xlu0 %445 }
 0x1f0   :  { %v493_v19 = vmul.f32 0.03125, %v446_v46 }
 0x1f2   :  { %v510_v47 = vsub.f32 %v493_v19, %v509_v45 }
 0x1f4   :  { %v573_v48 = vmul.f32 %v510_v47, %v510_v47 }
 0x1f6   :  { %v606_v49 = vsel %vm605_vm6, %v573_v48, 0.0 }
 0x1f7   :  { %637 = vadd.xlane.f32.xlu0 %v606_v49 }
 0x284   :  { %v638_v57 = vpop.xlane.xlu0 %637 }
 0x285   :  { %v639_v58 = vrot.slane %v638_v57, 4 }
 0x287   :  { %v640_v59 = vadd.f32 %v639_v58, %v638_v57 }
 0x289   :  { %v641_v60 = vrot.slane %v640_v59, 2 }
 0x28b   :  { %v642_v61 = vadd.f32 %v641_v60, %v640_v59 }
 0x28d   :  { %v643_v62 = vrot.slane %v642_v61, 1 }
 0x28f   :  { %v644_v63 = vadd.f32 %v643_v62, %v642_v61 }
 0x291   :  { %747 = vpush %v644_v63 }
 0x2c2   :  { %s748_s11 = spop %747 }
 0x2c3   :  { %v648_v1 = vstv %s748_s11 }
 0x2c4   :  { %v649_v2 = vsel %vm646_vm7, %v647_v0, %v648_v1 }
 0x2c5   :  { %650 = vst [vmem:[#allocation3] sm:$0x3] %v649_v2 }
 0x2c6   :  { %769 = shalt.err (!%p766_p4)
}
 0x2c7   :  { %s770_s15 = scalar_lea.hbm %s966_s6, 32 }
 0x2c8   :  { %p771_p5 = scmp.ne.s32.totalorder %s966_s6, %s770_s15  ;;  %p774_p6 = scmp.lt.u32.totalorder %s770_s15, %s966_s6 }
 0x2ca   :  { %p776_p7 = pnand %p774_p6, %p771_p5 }
 0x2cc   :  { %779 = shalt.err (!%p776_p7)
}
 0x2cd   :  { %660 = dma.vmem_to_hbm [thread:$0]  %s658_s10, 32, %s966_s6, [#allocation4]  }
 0x2ce   :  { %780 = dma.done.wait [#allocation4], 32  }
 0x2cf   :  { %781 = vsyncadd [#allocation4], 4294967264 }
 0x2d0   :  { %664 = vsyncpa [#allocation4], 1 }

</bundles_post_ra>
